<compile_context>
chip_gen: v7x
topology: tpu7x:2x2x1
jax: 0.10.0
libtpu: 0.0.40
codegen_flags: <defaults>
</compile_context>

<pallas_src>
import jax
import jax.numpy as jnp
from jax.experimental import pallas as pl
from jax.experimental.pallas import tpu as pltpu


# --------------------------------------------------------------------------- #
# Kernels
# --------------------------------------------------------------------------- #
def _giraffe_fold_kernel(w_ref, b_ref, *refs):
    """Edge weights pre-folded into K conv-weight copies (MXU does the combine).

    w_ref : (K, Cout, C) bf16  pre-scaled, BN-fused 1x1 conv weights (VMEM)
    b_ref : (Cout, 1)    f32   BN-fused bias (VMEM)
    refs[:-1] : K x (C, T)     input tiles, lane dim = spatial (VMEM)
    refs[-1]  : (Cout, T)      output tile (VMEM)
    """
    x_refs, o_ref = refs[:-1], refs[-1]
    mxu_dtype = w_ref.dtype
    # K bf16 MXU dots accumulated in f32 — replaces the VPU combine entirely.
    acc = jnp.dot(w_ref[0], x_refs[0][...].astype(mxu_dtype),
                  preferred_element_type=jnp.float32)
    for k in range(1, len(x_refs)):
        acc = acc + jnp.dot(w_ref[k], x_refs[k][...].astype(mxu_dtype),
                            preferred_element_type=jnp.float32)
    y = acc + b_ref[...]
    o_ref[...] = (y * jax.nn.sigmoid(y)).astype(o_ref.dtype)


def _giraffe_combine_kernel(wn_ref, w_ref, b_ref, *refs):
    """bf16 VPU weighted combine + single bf16 MXU dot (large-C path).

    wn_ref : (K,)       f32  relu'd + normalized edge weights (SMEM)
    w_ref  : (Cout, C)  bf16 BN-fused 1x1 conv weight (VMEM)
    b_ref  : (Cout, 1)  f32  BN-fused bias (VMEM)
    refs[:-1] : K x (C, T)   input tiles (VMEM)
    refs[-1]  : (Cout, T)    output tile (VMEM)
    """
    x_refs, o_ref = refs[:-1], refs[-1]
    cdt = x_refs[0].dtype                     # combine in the streamed dtype (bf16)
    acc = wn_ref[0].astype(cdt) * x_refs[0][...]
    for k in range(1, len(x_refs)):
        acc = acc + wn_ref[k].astype(cdt) * x_refs[k][...]
    # bf16 LHS/RHS into the MXU, f32 accumulate.
    y = jnp.dot(w_ref[...], acc.astype(w_ref.dtype),
                preferred_element_type=jnp.float32)
    y = y + b_ref[...]   # micro-opt left on the table: fold bias into the matmul
    o_ref[...] = (y * jax.nn.sigmoid(y)).astype(o_ref.dtype)


# --------------------------------------------------------------------------- #
# Sizing helpers
# --------------------------------------------------------------------------- #
def _vmem_capacity_bytes():
    try:
        return int(pltpu.get_tpu_info().vmem_capacity_bytes)
    except Exception:
        return 128 << 20        # v5e / v6e default


def _pick_spatial_tile(hw, bytes_per_col, n_batch, vmem_budget):
    """Largest 128-lane-aligned spatial tile under the VMEM budget.

    The grid uses pl.cdiv, so T does not have to divide H*W: every output
    column depends only on the same input column, so the masked tail block is
    safe.
    """
    cap = max(128, vmem_budget // max(bytes_per_col, 1))
    if cap >= hw:
        t = hw                                   # full-extent spatial block
    else:
        t = max(128, (cap // 128) * 128)         # 128-lane aligned
    # Keep >= 2 grid steps when possible so both TensorCores get work.
    if n_batch * pl.cdiv(hw, t) < 2 and hw >= 256:
        t = ((hw // 2 + 127) // 128) * 128
    return t


# --------------------------------------------------------------------------- #
# Wrapper
# --------------------------------------------------------------------------- #
def giraffe_node(xs, edge_weights, conv_w, conv_b,
                 bn_gamma, bn_beta, bn_mean, bn_var, bn_eps=1e-3,
                 stream_dtype=jnp.bfloat16, out_dtype=None,
                 fold_channel_threshold=128):
    """Fused GiraffeNode forward: fast-attention combine + 1x1 ConvBN + SiLU.

    xs           : list of K NCHW arrays with identical shape (N, C, H, W)
    edge_weights : (K,) learnable fusion weights (pre-relu)
    conv_w       : (Cout, C, 1, 1) 1x1 conv weight, conv_b: (Cout,)
    bn_*         : (Cout,) inference BatchNorm parameters
    stream_dtype : dtype activations are streamed through HBM / fed to the MXU
                   (bf16 halves HBM bytes and hits the bf16 MXU rate; feed
                   bf16 inputs upstream so the cast below is a no-op)
    out_dtype    : output dtype (defaults to stream_dtype)
    """
    K = len(xs)
    N, C, H, W = xs[0].shape
    HW = H * W
    Cout = conv_w.shape[0]
    out_dtype = stream_dtype if out_dtype is None else out_dtype

    # NCHW-native: only a free reshape, no transpose / stacked copy in HBM.
    xs_flat = [a.reshape(N, C, HW).astype(stream_dtype) for a in xs]

    # Fast-attention edge weights: relu + normalize once in the wrapper.
    wr = jnp.maximum(edge_weights.astype(jnp.float32), 0.0)
    wn = wr / (jnp.sum(wr) + 1e-4)                                   # (K,)

    # Fold inference BatchNorm into the 1x1 conv.
    # NOTE: bn_eps must match the real module (PyTorch BatchNorm2d default is
    # 1e-5; YOLO-style configs often use 1e-3).  Both kernel and reference
    # here take it as a parameter.
    scale = bn_gamma.astype(jnp.float32) / jnp.sqrt(bn_var.astype(jnp.float32) + bn_eps)
    w_fused = conv_w[:, :, 0, 0].astype(jnp.float32) * scale[:, None]        # (Cout, C)
    b_fused = (((conv_b.astype(jnp.float32) - bn_mean.astype(jnp.float32)) * scale
                + bn_beta.astype(jnp.float32))[:, None])                     # (Cout, 1)

    # Path selection: with C below one MXU contraction width, folding the edge
    # weights into K pre-scaled weight copies makes the MXU do the combine for
    # free (no VPU work, no bf16-VALU requirement on v5e).
    fold_combine = C <= fold_channel_threshold

    stream_isz = jnp.dtype(stream_dtype).itemsize
    out_isz = jnp.dtype(out_dtype).itemsize

    # Generation-aware VMEM budget.
    vmem_cap = _vmem_capacity_bytes()
    if vmem_cap <= (64 << 20):                 # v7x-class (64 MiB per TC)
        tile_budget, vmem_limit = 14 << 20, 40 << 20
    else:                                      # v5e / v6e (128 MiB)
        tile_budget, vmem_limit = 56 << 20, 96 << 20

    # Per-spatial-column VMEM bytes: double-buffered inputs + output plus the
    # combine / f32-matmul intermediates Mosaic materializes.
    bytes_per_col = (2 * K * C * stream_isz          # K inputs, 2 buffers each
                     + 2 * Cout * out_isz            # output, 2 buffers
                     + C * max(stream_isz, 2)        # combine accumulator
                     + 2 * Cout * 4)                 # f32 dot result + SiLU temp
    # Resident weights / bias come off the top of the budget.
    weight_bytes = 2 * ((K if fold_combine else 1) * Cout * C * 2 + Cout * 4)
    T = _pick_spatial_tile(HW, bytes_per_col, N,
                           max(tile_budget - weight_bytes, 1 << 20))
    grid = (N, pl.cdiv(HW, T))

    # TODO(synk): if a v7x trace shows exposed DMA at small T, sweep
    # pipeline_mode=pl.Buffered(3) on x_spec.
    x_spec = pl.BlockSpec((pl.Squeezed(), C, T), lambda n, j: (n, 0, j))
    out_spec = pl.BlockSpec((pl.Squeezed(), Cout, T), lambda n, j: (n, 0, j))

    if fold_combine:
        # (K, Cout, C) bf16: edge weights folded into the BN-fused weight.
        w_all = (wn[:, None, None] * w_fused[None]).astype(jnp.bfloat16)
        kernel = _giraffe_fold_kernel
        in_specs = ([pl.BlockSpec((K, Cout, C), lambda n, j: (0, 0, 0)),
                     pl.BlockSpec((Cout, 1), lambda n, j: (0, 0))]
                    + [x_spec] * K)
        operands = (w_all, b_fused, *xs_flat)
        mxu_flops_per_col = 2 * K * C * Cout
        vpu_flops_per_col = 4 * Cout
    else:
        # NOTE: for production shapes, pad Cout/C to multiples of 8 (ideally
        # >=128 / 256-aligned) to fill the MXU; tiny channels stay HBM-bound.
        w_bf16 = w_fused.astype(jnp.bfloat16)
        kernel = _giraffe_combine_kernel
        in_specs = ([pl.BlockSpec(memory_space=pltpu.MemorySpace.SMEM),
                     pl.BlockSpec((Cout, C), lambda n, j: (0, 0)),
                     pl.BlockSpec((Cout, 1), lambda n, j: (0, 0))]
                    + [x_spec] * K)
        operands = (wn, w_bf16, b_fused, *xs_flat)
        mxu_flops_per_col = 2 * C * Cout
        vpu_flops_per_col = 2 * K * C + 4 * Cout

    M = N * HW
    cost = pl.CostEstimate(
        flops=int(M * (mxu_flops_per_col + vpu_flops_per_col)),
        transcendentals=int(M * Cout),
        bytes_accessed=int(stream_isz * K * M * C + out_isz * M * Cout
                           + weight_bytes // 2 + 4 * (Cout + K)),
    )

    out = pl.pallas_call(
        kernel,
        out_shape=jax.ShapeDtypeStruct((N, Cout, HW), out_dtype),
        grid=grid,
        in_specs=in_specs,
        out_specs=out_spec,
        compiler_params=pltpu.CompilerParams(
            dimension_semantics=("parallel", "parallel"),
            vmem_limit_bytes=vmem_limit),
        cost_estimate=cost,
    )(*operands)

    # Free reshape back to NCHW — no transpose required.
    return out.reshape(N, Cout, H, W)


# --------------------------------------------------------------------------- #
# Pure-JAX reference (mirrors the PyTorch semantics)
# --------------------------------------------------------------------------- #
def giraffe_node_reference(xs, edge_weights, conv_w, conv_b,
                           bn_gamma, bn_beta, bn_mean, bn_var, bn_eps=1e-3):
    w = jnp.maximum(edge_weights, 0.0)
    combined = sum(w[i] * xs[i] for i in range(len(xs))) / (jnp.sum(w) + 1e-4)
    y = jax.lax.conv_general_dilated(
        combined, conv_w, window_strides=(1, 1), padding="VALID",
        dimension_numbers=("NCHW", "OIHW", "NCHW"))
    y = y + conv_b[None, :, None, None]
    y = (bn_gamma[None, :, None, None]
         * (y - bn_mean[None, :, None, None])
         / jnp.sqrt(bn_var[None, :, None, None] + bn_eps)
         + bn_beta[None, :, None, None])
    return y * jax.nn.sigmoid(y)


if __name__ == "__main__":
    key = jax.random.PRNGKey(0)

    # ---- Case 1: small spec shapes (fold path, C <= 128) -------------------
    N, C, H, W, Cout, K = 2, 4, 16, 16, 8, 2
    k1, k2, k3 = jax.random.split(key, 3)
    x0 = jax.random.normal(k1, (N, C, H, W), jnp.float32)
    x1 = jax.random.normal(k2, (N, C, H, W), jnp.float32)
    edge_weights = jnp.ones((K,), jnp.float32)          # fast-attention init
    conv_w = 0.1 * jax.random.normal(k3, (Cout, C, 1, 1), jnp.float32)
    conv_b = jnp.zeros((Cout,), jnp.float32)
    bn_gamma = 1.0 + 0.05 * jnp.arange(Cout, dtype=jnp.float32)
    bn_beta = 0.01 * jnp.arange(Cout, dtype=jnp.float32)
    bn_mean = 0.02 * jnp.arange(Cout, dtype=jnp.float32)
    bn_var = jnp.ones((Cout,), jnp.float32)

    out = giraffe_node([x0, x1], edge_weights, conv_w, conv_b,
                       bn_gamma, bn_beta, bn_mean, bn_var)
    out = jax.block_until_ready(out)
    ref = giraffe_node_reference([x0, x1], edge_weights, conv_w, conv_b,
                                 bn_gamma, bn_beta, bn_mean, bn_var)
    assert out.shape == (N, Cout, H, W)
    assert out.dtype == jnp.bfloat16
    assert jnp.allclose(out.astype(jnp.float32), ref, atol=5e-2, rtol=5e-2), \
        "case 1 mismatch vs reference"

    # ---- Case 2: larger channels + non-128-aligned H*W (combine path) ------
    N2, C2, H2, W2, Cout2, K2 = 1, 256, 20, 20, 64, 3
    kk = jax.random.split(key, 6)
    xs2 = [jax.random.normal(kk[i], (N2, C2, H2, W2), jnp.float32) for i in range(K2)]
    ew2 = jnp.array([1.0, 0.5, 1.5], jnp.float32)
    cw2 = 0.05 * jax.random.normal(kk[3], (Cout2, C2, 1, 1), jnp.float32)
    cb2 = 0.01 * jnp.ones((Cout2,), jnp.float32)
    g2 = jnp.ones((Cout2,), jnp.float32)
    b2 = jnp.zeros((Cout2,), jnp.float32)
    m2 = 0.1 * jnp.ones((Cout2,), jnp.float32)
    v2 = 1.5 * jnp.ones((Cout2,), jnp.float32)

    out2 = giraffe_node(xs2, ew2, cw2, cb2, g2, b2, m2, v2)
    out2 = jax.block_until_ready(out2)
    ref2 = giraffe_node_reference(xs2, ew2, cw2, cb2, g2, b2, m2, v2)
    assert out2.shape == (N2, Cout2, H2, W2)
    max_err = float(jnp.max(jnp.abs(out2.astype(jnp.float32) - ref2)))
    assert max_err < 8e-2, f"case 2 mismatch vs reference (max abs err {max_err})"

    # TODO(synk): GiraffeNode is a generic wrapper; arbitrary combine /
    # after_combine submodules (e.g. concat-combine, 3x3 conv, training-mode
    # BatchNorm) are not covered here — only the weighted-fusion + 1x1
    # ConvBN+SiLU instantiation used in giraffe_fpn.
    print("KERNEL_OK")
</pallas_src>

<mosaic_0001>
module attributes {stable_mosaic.version = 11 : i64} {
  func.func @_giraffe_fold_kernel(%arg0: i32, %arg1: i32, %arg2: memref<2x8x4xbf16, #tpu.memory_space<vmem>>, %arg3: memref<8x1xf32, #tpu.memory_space<vmem>>, %arg4: memref<1x4x256xbf16, #tpu.memory_space<vmem>>, %arg5: memref<1x4x256xbf16, #tpu.memory_space<vmem>>, %arg6: memref<1x8x256xbf16, #tpu.memory_space<vmem>>) attributes {dimension_semantics = [#tpu.dimension_semantics<parallel>, #tpu.dimension_semantics<parallel>], iteration_bounds = array<i64: 2, 1>, scalar_prefetch = 0 : i64, scratch_operands = 0 : i64, tpu.core_type = #tpu.core_type<tc>, window_params = [{pipeline_mode = #tpu.pipeline_mode<synchronous>, transform_indices = @transform_0, window_bounds = array<i64: 2, 8, 4>}, {pipeline_mode = #tpu.pipeline_mode<synchronous>, transform_indices = @transform_1, window_bounds = array<i64: 8, 1>}, {transform_indices = @transform_2, window_bounds = array<i64: 1, 4, 256>}, {transform_indices = @transform_3, window_bounds = array<i64: 1, 4, 256>}, {transform_indices = @transform_4, window_bounds = array<i64: 1, 8, 256>}]} {
    %c0 = arith.constant 0 : index
    %c0_0 = arith.constant 0 : index
    %c0_1 = arith.constant 0 : index
    %0 = vector.load %arg2[%c0, %c0_0, %c0_1] : memref<2x8x4xbf16, #tpu.memory_space<vmem>>, vector<1x8x4xbf16>
    %1 = vector.shape_cast %0 : vector<1x8x4xbf16> to vector<8x4xbf16>
    %c0_2 = arith.constant 0 : index
    %c0_3 = arith.constant 0 : index
    %c0_4 = arith.constant 0 : index
    %2 = vector.load %arg4[%c0_2, %c0_3, %c0_4] : memref<1x4x256xbf16, #tpu.memory_space<vmem>>, vector<1x4x256xbf16>
    %3 = vector.shape_cast %2 : vector<1x4x256xbf16> to vector<4x256xbf16>
    %cst = arith.constant dense<0.000000e+00> : vector<8x256xf32>
    %4 = tpu.matmul %1, %3, %cst {dimension_numbers = #tpu.dot_dimension_numbers<[1], [0], [0], [1], [0, 0, 1, 1], [], []>} : vector<8x4xbf16>, vector<4x256xbf16>, vector<8x256xf32> -> vector<8x256xf32>
    %c1 = arith.constant 1 : index
    %c0_5 = arith.constant 0 : index
    %c0_6 = arith.constant 0 : index
    %5 = vector.load %arg2[%c1, %c0_5, %c0_6] : memref<2x8x4xbf16, #tpu.memory_space<vmem>>, vector<1x8x4xbf16>
    %6 = vector.shape_cast %5 : vector<1x8x4xbf16> to vector<8x4xbf16>
    %c0_7 = arith.constant 0 : index
    %c0_8 = arith.constant 0 : index
    %c0_9 = arith.constant 0 : index
    %7 = vector.load %arg5[%c0_7, %c0_8, %c0_9] : memref<1x4x256xbf16, #tpu.memory_space<vmem>>, vector<1x4x256xbf16>
    %8 = vector.shape_cast %7 : vector<1x4x256xbf16> to vector<4x256xbf16>
    %cst_10 = arith.constant dense<0.000000e+00> : vector<8x256xf32>
    %9 = tpu.matmul %6, %8, %cst_10 {dimension_numbers = #tpu.dot_dimension_numbers<[1], [0], [0], [1], [0, 0, 1, 1], [], []>} : vector<8x4xbf16>, vector<4x256xbf16>, vector<8x256xf32> -> vector<8x256xf32>
    %10 = arith.addf %4, %9 : vector<8x256xf32>
    %c0_11 = arith.constant 0 : index
    %c0_12 = arith.constant 0 : index
    %11 = vector.load %arg3[%c0_11, %c0_12] : memref<8x1xf32, #tpu.memory_space<vmem>>, vector<8x1xf32>
    %12 = vector.broadcast %11 : vector<8x1xf32> to vector<8x256xf32>
    %13 = arith.addf %10, %12 : vector<8x256xf32>
    %14 = arith.negf %13 : vector<8x256xf32>
    %15 = math.exp %14 : vector<8x256xf32>
    %cst_13 = arith.constant 1.000000e+00 : f32
    %16 = vector.broadcast %cst_13 : f32 to vector<8x256xf32>
    %17 = arith.addf %16, %15 : vector<8x256xf32>
    %18 = arith.divf %16, %17 : vector<8x256xf32>
    %19 = arith.mulf %13, %18 : vector<8x256xf32>
    %20 = arith.truncf %19 : vector<8x256xf32> to vector<8x256xbf16>
    %c0_14 = arith.constant 0 : index
    %c0_15 = arith.constant 0 : index
    %c0_16 = arith.constant 0 : index
    %21 = vector.load %arg6[%c0_14, %c0_15, %c0_16] : memref<1x8x256xbf16, #tpu.memory_space<vmem>>, vector<1x8x256xbf16>
    %22 = vector.shape_cast %21 : vector<1x8x256xbf16> to vector<8x256xbf16>
    %23 = vector.shape_cast %20 : vector<8x256xbf16> to vector<1x8x256xbf16>
    tpu.vector_store %arg6[%c0_14, %c0_15, %c0_16], %23 {strides = array<i32>} : memref<1x8x256xbf16, #tpu.memory_space<vmem>>, vector<1x8x256xbf16>,
    return
  }
  func.func @transform_0(%arg0: i32, %arg1: i32) -> (i32, i32, i32) {
    %c0_i32 = arith.constant 0 : i32
    %c0_i32_0 = arith.constant 0 : i32
    %c0_i32_1 = arith.constant 0 : i32
    %c0_i32_2 = arith.constant 0 : i32
    return %c0_i32, %c0_i32_0, %c0_i32_1 : i32, i32, i32
  }
  func.func @transform_1(%arg0: i32, %arg1: i32) -> (i32, i32) {
    %c0_i32 = arith.constant 0 : i32
    %c0_i32_0 = arith.constant 0 : i32
    %c0_i32_1 = arith.constant 0 : i32
    return %c0_i32, %c0_i32_0 : i32, i32
  }
  func.func @transform_2(%arg0: i32, %arg1: i32) -> (i32, i32, i32) {
    %c0_i32 = arith.constant 0 : i32
    %c0_i32_0 = arith.constant 0 : i32
    return %arg0, %c0_i32, %arg1 : i32, i32, i32
  }
  func.func @transform_3(%arg0: i32, %arg1: i32) -> (i32, i32, i32) {
    %c0_i32 = arith.constant 0 : i32
    %c0_i32_0 = arith.constant 0 : i32
    return %arg0, %c0_i32, %arg1 : i32, i32, i32
  }
  func.func @transform_4(%arg0: i32, %arg1: i32) -> (i32, i32, i32) {
    %c0_i32 = arith.constant 0 : i32
    %c0_i32_0 = arith.constant 0 : i32
    return %arg0, %c0_i32, %arg1 : i32, i32, i32
  }
}

</mosaic_0001>

<bundles_post_ra>
// kernel: tpu_custom_call.1
= control target key start
LH: loop header
LB: loop body
LE: loop exit
PB: predicated region body
PF: predicated region fallthrough
CT: control target
= control target key end

     0   :  { %s1257_s0 = inlined_call_operand.hbm [shape: bf16[2,8,4], index: 0, kind: input, shape index: {}]   ;;  %s1258_s1 = inlined_call_operand.hbm [shape: f32[8,1], index: 1, kind: input, shape index: {}]   ;;  %s1259_s2 = inlined_call_operand.hbm [shape: bf16[2,4,256], index: 2, kind: input, shape index: {}]   ;;  %s1260_s3 = inlined_call_operand.hbm [shape: bf16[2,4,256], index: 3, kind: input, shape index: {}]   ;;  %s1261_s4 = inlined_call_operand.hbm [shape: bf16[2,8,256], index: 4, kind: output, shape index: {}]  }
   0x1   :  { %1272 = sst [smem:[#allocation15_spill]] %s1257_s0 }
   0x2   :  { %9 = vsyncpa [#allocation3], 0 }
   0x3   :  { %10 = vsyncpa [#allocation6], 0 }
   0x4   :  { %11 = vsyncpa [#allocation4], 0 }
   0x5   :  { %13 = vsyncpa [#allocation4 + $0x1], 0  ;;  %s976_s15 = smov 0   ;;  %s978_s16 = smov 0  }
   0x6   :  { %s980_s17 = smov 0   ;;  %s982_s18 = smov 0  }
   0x7   :  { %s984_s19 = smov 0   ;;  %s986_s20 = smov 0  }
   0x8 LB: > { %s1007_s21 = sadd.s32 4294967295, %s941_s20   ;;  %s600_s22 = sadd.s32 4294967294, %s941_s20   ;;  %s941_s20 = sphi %s986_s20, %s19_s20   ;;  %s937_s19 = sphi %s984_s19, %s1303_s19   ;;  %s933_s18 = sphi %s982_s18, %s1302_s18   ;;  %s929_s17 = sphi %s980_s17, %s1301_s17   ;;  %s925_s16 = sphi %s978_s16, %s1300_s16   ;;  %s921_s15 = sphi %s976_s15, %s1299_s15  }
   0x9   : > { %p95_p0 = scmp.ne.s32.totalorder %s925_s16, %s921_s15  ;;  %p1262_p1 = scmp.eq.s32.totalorder %s1007_s21, 0 }
   0xa   : > { %p155_p3 = scmp.eq.s32.totalorder %s600_s22, 1  ;;  %p601_p5 = scmp.ge.s32.totalorder %s941_s20, 1 }
   0xb   : > { %p1016_p4 = por %p1262_p1, %p95_p0  ;;  %p162_p7 = scmp.lt.s32.totalorder %s941_s20, 3 }
   0xc   : > { %p1021_p6 = por %p155_p3, %p95_p0  ;;  %s943_s26 = smov [#allocation2]  }
   0xd   : > { %s1273_s23 = scalar_select %p1016_p4, 1, 0 }
   0xe   : > { %s1274_s24 = scalar_select %p1021_p6, 1, 0 }
   0xf   : > { %p1026_p8 = pnand %p601_p5, %p162_p7  ;;  %s174_s27 = sshll.u32 %s943_s26, 4  ;;  %s175_s27 = int_to_ptr.vmem [resolvable:$true] %s174_s27 }
  0x10   : > { %s31_s29 = sadd.s32 1, %s937_s19  ;;  %s1277_s0 = sld [smem:[#allocation15_spill]] }
  0x11   : > { %s1275_s25 = scalar_select %p1026_p8, 1, 0 }
  0x12   : > { %p649_p9 = pneg %p1026_p8 }
  0x14   : > { %p1035_p11 = pnand %p649_p9, %p1262_p1 }
  0x16   : > { %s735_s6 = scalar_lea.hbm %s1277_s0, 128  ;;  %p1267_p13 = pneg %p1035_p11 }
  0x17   : > { %p736_p12 = scmp.ne.s32.totalorder %s1277_s0, %s735_s6  ;;  %p742_p5 = scmp.lt.u32.totalorder %s735_s6, %s1277_s0 }
  0x19   : > { %p738_p0 = pnand %p1267_p13, %p736_p12 }
  0x1b   : > { %p739_p3 = pneg %p738_p0 }
  0x1d   : > { %p744_p7 = pnand %p742_p5, %p739_p3 }
  0x1f   : > { %747 = shalt.err (!%p744_p7)
}
  0x20   : > { %s748_s11 = scalar_lea.vmem %s175_s27, 128  ;;  %p756_p2 = scmp.lt.s32.totalorder %s175_s27, %s175_s27 }
  0x21   : > { %p749_p9 = scmp.ne.s32.totalorder %s175_s27, %s748_s11  ;;  %p757_p6 = scmp.lt.s32.totalorder %s748_s11, %s748_s11 }
  0x23   : > { %p751_p10 = pnand %p749_p9, %p1267_p13  ;;  %p758_p4 = por %p757_p6, %p756_p2 }
  0x25   : > { %p752_p1 = pneg %p751_p10 }
  0x27   : > { %p759_p8 = pnand %p758_p4, %p752_p1 }
  0x29   : > { %762 = shalt.err (!%p759_p8)
}
  0x2a   : > { %s944_s12 = smov 64   ;;  %s945_s13 = smov 4  }
  0x2b   : > { %652 = dma.hbm_to_vmem [thread:$0]  (!%p1035_p11), %s1277_s0, 128, %s175_s27, [#allocation3], %s944_s12, %s944_s12, %s945_s13  }
  0x2c   : > { %p33_p1 = scmp.ge.s32.totalorder %s31_s29, 2  ;;  %s82_s26 = sadd.s32 1, %s929_s17 }
  0x2d   : > { %p89_p2 = scmp.ne.s32.totalorder %s929_s17, %s925_s16  ;;  %p90_p4 = scmp.eq.s32.totalorder %s941_s20, 0 }
  0x2e   : > { %s1305_s29 = smov (%p33_p1, %s31_s29), 0  ;;  %p1280_p8 = scmp.eq.s32.totalorder %s1007_s21, 1 }
  0x2f   : > { %1278 = sst [smem:[#allocation14_spill]] %s1305_s29  ;;  %p1068_p6 = por %p90_p4, %p89_p2 }
  0x30   : > { %p1074_p10 = por %p1280_p8, %p89_p2  ;;  %s77_s6 = ssub.s32 %s937_s19, %s1305_s29 }
  0x31   : > { %p669_p12 = scmp.lt.s32.totalorder %s941_s20, 2  ;;  %p80_p0 = scmp.eq.s32.totalorder %s77_s6, 0 }
  0x32   : > { %s1281_s5 = scalar_select %p1074_p10, 1, 0 }
  0x33   : > { %s199_s27 = sand.u32 1, %s941_s20   ;;  %s201_s7 = sand.u32 1, %s929_s17  }
  0x34   : > { %s1084_s8 = scalar_select %p80_p0, %s929_s17, %s82_s26  }
  0x35   : > { %s1086_s9 = sshll.u32 %s201_s7, 2  ;;  %s1265_s10 = sshll.u32 %s937_s19, 6 }
  0x36   : > { %s1094_s13 = scalar_lea.hbm %s1259_s2, %s1265_s10  ;;  %s203_s14 = scalar_lea.vmem [#allocation7], %s1086_s9 }
  0x37   : > { %s213_s22 = sshll.u32 %s203_s14, 4  ;;  %p1099_p3 = pnand %p669_p12, %p1068_p6  ;;  %s1103_s22 = int_to_ptr.vmem [resolvable:$true] %s213_s22 }
  0x38   : > { %s946_s6 = smov [#allocation5]   ;;  %s1107_s11 = scalar_lea.sflag [#allocation3], %s199_s27 }
  0x39   : > { %s1282_s26 = scalar_select %p1099_p3, 1, 0 }
  0x3a   : > { %s1105_s7 = sshll.u32 %s946_s6, 4  ;;  %s763_s12 = scalar_lea.hbm %s1094_s13, 64  ;;  %s189_s7 = int_to_ptr.vmem [resolvable:$true] %s1105_s7 }
  0x3b   : > { %p764_p5 = scmp.ne.s32.totalorder %s1094_s13, %s763_s12  ;;  %p1269_p7 = pneg %p1099_p3 }
  0x3c   : > { %s768_s10 = scalar_lea.hbm %s1259_s2, 128  ;;  %p769_p2 = scmp.lt.u32.totalorder %s1094_s13, %s1259_s2 }
  0x3d   : > { %p766_p9 = pnand %p1269_p7, %p764_p5  ;;  %p770_p4 = scmp.lt.u32.totalorder %s768_s10, %s763_s12 }
  0x3e   : > { %p772_p8 = scmp.lt.u32.totalorder %s763_s12, %s1094_s13 }
  0x3f   : > { %p767_p1 = pneg %p766_p9  ;;  %p771_p6 = por %p770_p4, %p769_p2 }
  0x41   : > { %p773_p12 = por %p772_p8, %p771_p6 }
  0x43   : > { %p774_p0 = pnand %p773_p12, %p767_p1 }
  0x45   : > { %777 = shalt.err (!%p774_p0)
}
  0x46   : > { %s778_s27 = scalar_lea.vmem %s1103_s22, 64  ;;  %s947_s6 = smov [#allocation7]  }
  0x47   : > { %p779_p5 = scmp.ne.s32.totalorder %s1103_s22, %s778_s27  ;;  %s783_s30 = sshll.u32 %s947_s6, 4  ;;  %s784_s30 = int_to_ptr.vmem [resolvable:$false] %s783_s30 }
  0x48   : > { %s785_s0 = scalar_lea.vmem %s784_s30, 128  ;;  %p786_p10 = scmp.lt.s32.totalorder %s1103_s22, %s784_s30 }
  0x49   : > { %p781_p9 = pnand %p779_p5, %p1269_p7  ;;  %p787_p2 = scmp.lt.s32.totalorder %s785_s0, %s778_s27 }
  0x4b   : > { %p782_p13 = pneg %p781_p9  ;;  %p788_p4 = por %p787_p2, %p786_p10 }
  0x4d   : > { %p789_p6 = pnand %p788_p4, %p782_p13 }
  0x4f   : > { %792 = shalt.err (!%p789_p6)
}
  0x50   : > { %659 = dma.hbm_to_vmem [thread:$0]  (!%p1099_p3), %s1094_s13, 64, %s1103_s22, %s1107_s11  }
  0x51   : > { %s793_s12 = scalar_lea.hbm %s1258_s1, 128  ;;  %p1283_p13 = pneg %p1035_p11 }
  0x52   : > { %p794_p1 = scmp.ne.s32.totalorder %s1258_s1, %s793_s12  ;;  %p800_p12 = scmp.lt.u32.totalorder %s793_s12, %s1258_s1 }
  0x54   : > { %p796_p10 = pnand %p794_p1, %p1283_p13 }
  0x56   : > { %p797_p8 = pneg %p796_p10 }
  0x58   : > { %p802_p0 = pnand %p800_p12, %p797_p8 }
  0x5a   : > { %805 = shalt.err (!%p802_p0)
}
  0x5b   : > { %s806_s13 = scalar_lea.vmem %s189_s7, 128  ;;  %p1284_p9 = pmov %p1283_p13 }
  0x5c   : > { %p807_p5 = scmp.ne.s32.totalorder %s189_s7, %s806_s13  ;;  %p814_p6 = scmp.lt.s32.totalorder %s189_s7, %s189_s7 }
  0x5d   : > { %p815_p7 = scmp.lt.s32.totalorder %s806_s13, %s806_s13 }
  0x5e   : > { %p809_p2 = pnand %p807_p5, %p1284_p9 }
  0x5f   : > { %p816_p3 = por %p815_p7, %p814_p6 }
  0x60   : > { %p810_p4 = pneg %p809_p2 }
  0x62   : > { %p817_p1 = pnand %p816_p3, %p810_p4 }
  0x64   : > { %820 = shalt.err (!%p817_p1)
}
  0x65   : > { %655 = dma.hbm_to_vmem [thread:$0]  (!%p1035_p11), %s1258_s1, 128, %s189_s7, [#allocation6]  }
  0x66   : > { %s1285_s29 = sshll.u32 %s937_s19, 6  ;;  %s224_s6 = scalar_lea.vmem [#allocation8], %s1086_s9 }
  0x67   : > { %s1161_s14 = scalar_lea.hbm %s1260_s3, %s1285_s29  ;;  %s234_s27 = sshll.u32 %s224_s6, 4  ;;  %s235_s27 = int_to_ptr.vmem [resolvable:$true] %s234_s27 }
  0x68   : > { %s821_s28 = scalar_lea.hbm %s1161_s14, 64  ;;  %p1286_p7 = scmp.ne.s32.totalorder %s1282_s26, 0 }
  0x69   : > { %p822_p3 = scmp.ne.s32.totalorder %s1161_s14, %s821_s28  ;;  %s826_s13 = scalar_lea.hbm %s1260_s3, 128 }
  0x6a   : > { %p1287_p13 = pneg %p1286_p7  ;;  %p827_p11 = scmp.lt.u32.totalorder %s1161_s14, %s1260_s3 }
  0x6b   : > { %p828_p12 = scmp.lt.u32.totalorder %s826_s13, %s821_s28  ;;  %p830_p5 = scmp.lt.u32.totalorder %s821_s28, %s1161_s14 }
  0x6c   : > { %p824_p10 = pnand %p822_p3, %p1287_p13 }
  0x6d   : > { %p829_p0 = por %p828_p12, %p827_p11 }
  0x6e   : > { %p825_p8 = pneg %p824_p10 }
  0x6f   : > { %p831_p9 = por %p830_p5, %p829_p0 }
  0x71   : > { %p832_p2 = pnand %p831_p9, %p825_p8 }
  0x73   : > { %835 = shalt.err (!%p832_p2)
}
  0x74   : > { %s836_s9 = scalar_lea.vmem %s235_s27, 64  ;;  %p1288_p6 = pmov %p1287_p13 }
  0x75   : > { %p837_p4 = scmp.ne.s32.totalorder %s235_s27, %s836_s9  ;;  %s948_s29 = smov [#allocation8]  }
  0x76   : > { %s841_s10 = sshll.u32 %s948_s29, 4  ;;  %s842_s10 = int_to_ptr.vmem [resolvable:$false] %s841_s10 }
  0x77   : > { %p839_p1 = pnand %p837_p4, %p1288_p6  ;;  %s843_s12 = scalar_lea.vmem %s842_s10, 128 }
  0x78   : > { %p844_p13 = scmp.lt.s32.totalorder %s235_s27, %s842_s10  ;;  %p845_p10 = scmp.lt.s32.totalorder %s843_s12, %s836_s9 }
  0x79   : > { %p840_p3 = pneg %p839_p1 }
  0x7a   : > { %p846_p11 = por %p845_p10, %p844_p13 }
  0x7c   : > { %p847_p12 = pnand %p846_p11, %p840_p3 }
  0x7e   : > { %850 = shalt.err (!%p847_p12)
}
  0x7f   : > { %662 = dma.hbm_to_vmem [thread:$0]  (!%p1286_p7), %s1161_s14, 64, %s235_s27, %s1107_s11  }
  0x80   : > { %p1289_p8 = scmp.ne.s32.totalorder %s1275_s25, 0 }
  0x81   : > { %p1290_p0 = scmp.eq.s32.totalorder (!%p1289_p8), %s1007_s21, 0 }
  0x82   : > { %243 = sbr.rel (%p1289_p8) target bundleno = 416 (0x1a0), region = 36 }
  0x89   : > { %904 = dma.done.wait (%p1290_p0), [#allocation3], 128   ;;  %p1291_p5 = pmov %p1290_p0 }
  0x8a   : > { %p1292_p9 = pmov %p1290_p0 }
  0x8b   : > { %906 = vsyncadd (%p1291_p5), [#allocation3], 4294967168 }
  0x8c   : > { %908 = dma.done.wait (%p1292_p9), [#allocation6], 128   ;;  %p1293_p2 = pmov %p1290_p0 }
  0x8d   : > { %s253_s26 = sand.u32 1, %s1007_s21   ;;  %s1196_s11 = sand.u32 1, %s925_s16  }
  0x8e   : > { %910 = vsyncadd (%p1293_p2), [#allocation6], 4294967168  ;;  %s614_s25 = sshll.u32 %s1196_s11, 2  ;;  %s254_s14 = scalar_lea.sflag [#allocation3], %s253_s26 }
  0x8f   : > { %s257_s6 = scalar_lea.vmem [#allocation7], %s614_s25  ;;  %p1294_p7 = scmp.ne.s32.totalorder %s1273_s23, 0 }
  0x91   : > { %912 = dma.done.wait (%p1294_p7), %s254_s14, 128  }
  0x92   : > { %914 = vsyncadd (%p1294_p7), %s254_s14, 4294967168  ;;  %v949_v0 = vmov 0   ;;  %vm318_vm0 = vcmask 1041408   ;;  %s266_s27 = scalar_lea.vmem [#allocation8], %s614_s25  ;;  %v425_v5 = vld [vmem:[#allocation5] sm:$0xff]  ;;  %vm314_vm1 = vcmask 31744  }
  0x93   : > { %357 = vmatprep.mubr.bf16.mxu0 %v949_v0  ;;  %416 = vmatprep.mubr.bf16.mxu1 %v949_v0  ;;  %v617_v1 = vld.sshfl [vmem:[%s266_s27] sm:$0x33 pattern:$0x76325410]  ;;  %v303_v8 = vld [vmem:[#allocation2 + $0x4] sm:$0xf] }
  0x94   : > { %726 = vset.pattern.permute.xlu0 %v949_v0  ;;  %v313_v2 = vcombine.high %v617_v1, %v617_v1  ;;  %v620_v3 = vld.sshfl [vmem:[%s257_s6] sm:$0x33 pattern:$0x76325410]  ;;  %v320_v4 = vsel %vm318_vm0, %v617_v1, 0  ;;  %s616_s21 = sshll.u32 %s1196_s11, 3 }
  0x95   : > { %v374_v6 = vcombine.high %v620_v3, %v620_v3  ;;  %v379_v7 = vsel %vm318_vm0, %v620_v3, 0  ;;  %428 = vperm.xlu0 %726, %v425_v5   ;;  %v300_v9 = vld [vmem:[#allocation2] sm:$0xf]  ;;  %s634_s23 = sshll.u32 %s933_s18, 7  ;;  %s295_s28 = scalar_lea.vmem [#allocation9], %s616_s21 }
  0x96   : > { %618 = vmatprep.subr.msk.bf16.mxu0 %vm318_vm0, %v313_v2  ;;  %s473_s7 = sshll.u32 %s295_s28, 4  ;;  %s1208_s22 = scalar_lea.hbm %s1261_s4, %s634_s23  ;;  %s1210_s7 = int_to_ptr.vmem [resolvable:$true] %s473_s7 }
  0x97   : > { %621 = vmatprep.subr.msk.bf16.mxu1 %vm318_vm0, %v374_v6  ;;  %326 = vmatpush1.bf16.msra.mxu0 %v320_v4  ;;  %s457_s0 = scalar_lea.sflag [#allocation4], %s1196_s11  ;;  %s851_s9 = scalar_lea.vmem %s1210_s7, 128 }
  0x98   : > { %385 = vmatpush1.bf16.msra.mxu1 %v379_v7  ;;  %p852_p4 = scmp.ne.s32.totalorder %s1210_s7, %s851_s9  ;;  %p1295_p6 = scmp.ne.s32.totalorder %s1281_s5, 0 }
  0x99   : > { %s950_s18 = smov [#allocation9]  }
  0x9a   : > { %619 = vmatmul.mubr.msk.bf16.vlgmr.msra.gmra.mrb[0].mxu0 %vm314_vm1, %v303_v8  ;;  %p853_p1 = pnand %p852_p4, %p1295_p6  ;;  %s855_s29 = sshll.u32 %s950_s18, 4  ;;  %s856_s29 = int_to_ptr.vmem [resolvable:$false] %s855_s29 }
  0x9b   : > { %622 = vmatmul.mubr.msk.bf16.vlgmr.msra.gmra.mrb[0].mxu1 %vm314_vm1, %v300_v9  ;;  %s857_s10 = scalar_lea.vmem %s856_s29, 256  ;;  %p858_p13 = scmp.lt.s32.totalorder %s1210_s7, %s856_s29 }
  0x9c   : > { %p854_p3 = pneg %p853_p1  ;;  %p859_p10 = scmp.lt.s32.totalorder %s857_s10, %s851_s9 }
  0x9e   : > { %p860_p11 = por %p859_p10, %p858_p13 }
  0xa0   : > { %p861_p12 = pnand %p860_p11, %p854_p3 }
 0x114   : > { %v429_v11 = vpop.permute.xlu0 %428 }
 0x16d   : > { %v359_v10 = vpop.f32.mrb[0].mxu0 }
 0x16e   : > { %v418_v12 = vpop.f32.mrb[0].mxu1  ;;  %v361_v13 = vpop.f32.mrb[1].mxu0 }
 0x16f   : > { %v419_v14 = vadd.f32 %v418_v12, %v359_v10  ;;  %v420_v15 = vpop.f32.mrb[1].mxu1  ;;  %v363_v16 = vpop.f32.mrb[2].mxu0 }
 0x170   : > { %v421_v17 = vadd.f32 %v420_v15, %v361_v13  ;;  %v422_v18 = vpop.f32.mrb[2].mxu1  ;;  %v364_v19 = vpop.f32.mrb[3].mxu0 }
 0x171   : > { %v431_v20 = vadd.f32 %v429_v11, %v419_v14  ;;  %v423_v21 = vpop.f32.mrb[3].mxu1 }
 0x172   : > { %v432_v22 = vadd.f32 %v429_v11, %v421_v17 }
 0x173   : > { %v623_v23 = vmul.f32 -1.442695, %v431_v20 }
 0x174   : > { %v624_v24 = vmul.f32 -1.442695, %v432_v22 }
 0x175   : > { %727 = vpow2.f32 %v623_v23 }
 0x176   : > { %729 = vpow2.f32 %v624_v24 }
 0x17f   : > { %v728_v25 = vpop.eup %727 }
 0x180   : > { %v730_v26 = vpop.eup %729  ;;  %v439_v27 = vadd.f32 1.0, %v728_v25 }
 0x181   : > { %v440_v28 = vadd.f32 1.0, %v730_v26 }
 0x182   : > { %731 = vrcp.f32 %v439_v27 }
 0x183   : > { %733 = vrcp.f32 %v440_v28 }
 0x18c   : > { %v732_v29 = vpop.eup %731 }
 0x18d   : > { %v734_v30 = vpop.eup %733  ;;  %v445_v31 = vmul.f32 %v732_v29, %v431_v20 }
 0x18e   : > { %v446_v32 = vmul.f32 %v734_v30, %v432_v22 }
 0x190   : > { %v633_v33 = vpack.c.bf16 %v446_v32, %v445_v31 }
 0x192   : > { %455 = vst [vmem:[%s295_s28] sm:$0xff] %v633_v33 }
 0x193   : > { %864 = shalt.err (!%p861_p12)
}
 0x194   : > { %s865_s12 = scalar_lea.hbm %s1208_s22, 128  ;;  %s869_s25 = scalar_lea.hbm %s1261_s4, 256 }
 0x195   : > { %p866_p8 = scmp.ne.s32.totalorder %s1208_s22, %s865_s12  ;;  %p870_p9 = scmp.lt.u32.totalorder %s1208_s22, %s1261_s4 }
 0x196   : > { %p871_p2 = scmp.lt.u32.totalorder %s869_s25, %s865_s12  ;;  %p873_p4 = scmp.lt.u32.totalorder %s865_s12, %s1208_s22 }
 0x197   : > { %p867_p0 = pnand %p866_p8, %p1295_p6 }
 0x198   : > { %p872_p7 = por %p871_p2, %p870_p9 }
 0x199   : > { %p868_p5 = pneg %p867_p0 }
 0x19a   : > { %p874_p1 = por %p873_p4, %p872_p7 }
 0x19c   : > { %p875_p3 = pnand %p874_p1, %p868_p5 }
 0x19e   : > { %878 = shalt.err (!%p875_p3)
}
 0x19f   : > { %647 = dma.vmem_to_hbm [thread:$0]  (%p1295_p6), %s1210_s7, 128, %s1208_s22, %s457_s0  }
 0x1a0 PF: > { %s485_s27 = sand.u32 1, %s921_s15   ;;  %p1296_p13 = scmp.ne.s32.totalorder %s1274_s24, 0 }
 0x1a1   : > { %p1297_p10 = scmp.ge.s32.totalorder %s941_s20, 2  ;;  %s486_s21 = scalar_lea.sflag [#allocation4], %s485_s27 }
 0x1a3   : > { %p664_p11 = pnand %p1297_p10, %p1296_p13 }
 0x1a5   : > { %916 = dma.done.wait (!%p664_p11), %s486_s21, 128  }
 0x1a6   : > { %918 = vsyncadd (!%p664_p11), %s486_s21, 4294967168  ;;  %s19_s20 = sadd.s32 1, %s941_s20   ;;  %s1298_s5 = sld [smem:[#allocation14_spill]] }
 0x1a7   : > { %p16_p12 = scmp.ge.s32.totalorder %s19_s20, 4   ;;  %s1299_s15 = smov %s925_s16 }
 0x1a8   : > { %s1300_s16 = smov %s929_s17  ;;  %s1301_s17 = smov %s1084_s8 }
 0x1a9   : > { %s1302_s18 = smov %s937_s19  ;;  %18 = sbr.rel (!%p16_p12) target bundleno = 8 (0x8), region = 100 }
 0x1ac   : > { %s1303_s19 = smov %s1298_s5 }
 0x1b0   :  { %491 = vsyncpa [#allocation3], 1 }
 0x1b1   :  { %493 = vsyncpa [#allocation3 + $0x1], 1 }
 0x1b2   :  { %494 = vsyncpa [#allocation6], 1 }
 0x1b3   :  { %495 = vsyncpa [#allocation4], 1 }
 0x1b4   :  { %497 = vsyncpa [#allocation4 + $0x1], 1 }

</bundles_post_ra>
